<compile_context>
chip_gen: v7x
topology: tpu7x:2x2x1
jax: 0.10.0
libtpu: 0.0.40
codegen_flags: <defaults>
</compile_context>

<pallas_src>
import functools
import math

import jax
import jax.numpy as jnp
from jax.experimental import pallas as pl
from jax.experimental.pallas import tpu as pltpu


MASK_VAL = -1e30     # additive mask for non-edges (f32 logit space)
DENOM_EPS = 1e-30    # guards dst rows with no in-edges (e.g. padded rows)


def _round_up(x, m):
    return ((x + m - 1) // m) * m


def _choose_tiles(n):
    """Returns (n_pad, tile_dst, tile_src)."""
    if n <= 256:
        n_pad = _round_up(max(n, 8), 8)
        return n_pad, n_pad, n_pad
    # Lane-aligned tiles that fit v7x's 64 MiB VMEM with double buffering and
    # keep n_d >= 2 (megacore sharding of the "parallel" dst axis).
    n_pad = _round_up(n, 512)
    return n_pad, 256, 512


# ---------------------------------------------------------------------------
# Pallas kernels
# ---------------------------------------------------------------------------
def proj_kernel(h_ref, w_ref, am_ref, z_ref, sc_ref):
    """All-heads-fused projection + per-node attention scores.

    z  = h @ W_all                          (TD, H*F)  lane-dense
    sc = z @ [al_mat | ar_mat]              (TD, 2H)   -> el / er per node
    """
    z32 = jnp.dot(h_ref[...], w_ref[...], preferred_element_type=jnp.float32)
    z_ref[...] = z32.astype(z_ref.dtype)
    sc_ref[...] = jnp.dot(z32, am_ref[...], preferred_element_type=jnp.float32)


def gat_attn_kernel(bmap_ref, adj_ref, zsrc_ref, el_ref, er_ref, o_ref,
                    m_sc, l_sc, acc_sc, *,
                    num_heads, f_out, negative_slope, is_final, compute_dtype):
    """Edge-softmax attention + aggregation, online softmax over src tiles.
    Grid: (dst_tile [parallel], src_tile [arbitrary/reduction]).
    bmap_ref is a scalar-prefetched (SMEM) flat map of nonzero adjacency
    blocks used to skip empty (dst_tile, src_tile) blocks entirely."""
    d = pl.program_id(0)
    s = pl.program_id(1)
    n_src = pl.num_programs(1)

    @pl.when(s == 0)
    def _init():
        m_sc[...] = jnp.full(m_sc.shape, MASK_VAL, m_sc.dtype)
        l_sc[...] = jnp.zeros(l_sc.shape, l_sc.dtype)
        acc_sc[...] = jnp.zeros(acc_sc.shape, acc_sc.dtype)

    @pl.when(bmap_ref[d * n_src + s] > 0)
    def _compute():
        # Mask math hoisted out of the head loop (one compare / two selects
        # per tile instead of two selects per element per head).
        edge_f = adj_ref[...].astype(jnp.float32)           # (TD, TS) 0/1
        has_edge = edge_f > 0.0
        madd = jnp.where(has_edge, 0.0, MASK_VAL)            # additive mask
        mmul = jnp.where(has_edge, 1.0, 0.0)                 # multiplicative

        z_src = zsrc_ref[...]                                # (TS, H*F)
        el_all = el_ref[...]                                 # (H, TS) f32
        er_all = er_ref[...]                                 # (TD, H) f32

        for hd in range(num_heads):                          # H tiny -> unroll
            lo = hd * f_out
            zs = z_src[:, lo:lo + f_out]                     # (TS, F)
            e = er_all[:, hd:hd + 1] + el_all[hd:hd + 1, :]  # (TD, TS)
            e = jnp.where(e > 0.0, e, negative_slope * e)    # LeakyReLU
            e = e + madd                                     # mask non-edges

            m_prev = m_sc[hd, :, :]                          # (TD, 1)
            m_new = jnp.maximum(m_prev, jnp.max(e, axis=-1, keepdims=True))
            corr = jnp.exp(m_prev - m_new)
            # Explicit zeroing after exp is required for tiled online softmax:
            # a dst row may have no edge in the src tiles seen so far.
            p = jnp.exp(e - m_new) * mmul                    # (TD, TS) f32

            l_sc[hd, :, :] = corr * l_sc[hd, :, :] + jnp.sum(p, axis=-1,
                                                             keepdims=True)
            acc_sc[hd, :, :] = corr * acc_sc[hd, :, :] + jnp.dot(
                p.astype(compute_dtype), zs, preferred_element_type=jnp.float32)
            m_sc[hd, :, :] = m_new

    @pl.when(s == n_src - 1)
    def _finalize():
        if is_final:
            # fused: per-head normalization -> mean over heads -> log_softmax
            tot = None
            for hd in range(num_heads):
                o_h = acc_sc[hd, :, :] / jnp.maximum(l_sc[hd, :, :], DENOM_EPS)
                tot = o_h if tot is None else tot + o_h
            logits = tot * (1.0 / num_heads)
            mx = jnp.max(logits, axis=-1, keepdims=True)
            sh = logits - mx
            lse = jnp.log(jnp.sum(jnp.exp(sh), axis=-1, keepdims=True))
            o_ref[...] = (sh - lse).astype(o_ref.dtype)
        else:
            for hd in range(num_heads):
                o_h = acc_sc[hd, :, :] / jnp.maximum(l_sc[hd, :, :], DENOM_EPS)
                # ELU(alpha=1); exp(min(x,0)) avoids overflow on the dead branch
                o_h = jnp.where(o_h > 0.0, o_h,
                                jnp.exp(jnp.minimum(o_h, 0.0)) - 1.0)
                o_ref[:, hd * f_out:(hd + 1) * f_out] = o_h.astype(o_ref.dtype)


# ---------------------------------------------------------------------------
# Wrappers around pallas_call
# ---------------------------------------------------------------------------
def gat_conv_layer(h, layer, adj_i8, bmap, *, tile_d, tile_s, negative_slope,
                   is_final, compute_dtype):
    """h: (N_pad, F_in); layer: W (H,F_in,F_out), attn_l/attn_r (H,1,F_out);
    adj_i8: (N_pad, N_pad) int8 0/1 mask (adj[dst, src], self-loops included);
    bmap: flat (n_d*n_s,) int32 nonzero-block map.
    Hidden layers return (N_pad, H*F_out); the final layer returns
    (N_pad, F_out) log-probabilities (head-mean + log_softmax fused)."""
    W, attn_l, attn_r = layer["W"], layer["attn_l"], layer["attn_r"]
    num_heads, f_in, f_out = W.shape
    n_pad = h.shape[0]
    hf = num_heads * f_out
    n_d = n_pad // tile_d
    n_s = n_pad // tile_s

    # all heads fused into one projection matrix (F_in, H*F_out)
    w_all = jnp.transpose(W, (1, 0, 2)).reshape(f_in, hf).astype(compute_dtype)
    h_c = h.astype(compute_dtype)

    # block-diagonal score matrices: one tiny matmul yields per-node el / er
    eye = jnp.eye(num_heads, dtype=jnp.float32)
    al_mat = (attn_l[:, 0, :, None] * eye[:, None, :]).reshape(hf, num_heads)
    ar_mat = (attn_r[:, 0, :, None] * eye[:, None, :]).reshape(hf, num_heads)
    am = jnp.concatenate([al_mat, ar_mat], axis=1)          # (HF, 2H) f32

    z, sc = pl.pallas_call(
        proj_kernel,
        out_shape=(jax.ShapeDtypeStruct((n_pad, hf), compute_dtype),
                   jax.ShapeDtypeStruct((n_pad, 2 * num_heads), jnp.float32)),
        grid=(n_d,),
        in_specs=[pl.BlockSpec((tile_d, f_in), lambda i: (i, 0)),
                  pl.BlockSpec((f_in, hf), lambda i: (0, 0)),
                  pl.BlockSpec((hf, 2 * num_heads), lambda i: (0, 0))],
        out_specs=[pl.BlockSpec((tile_d, hf), lambda i: (i, 0)),
                   pl.BlockSpec((tile_d, 2 * num_heads), lambda i: (i, 0))],
        compiler_params=pltpu.CompilerParams(
            dimension_semantics=("parallel",),
            vmem_limit_bytes=32 * 1024 * 1024),
    )(h_c, w_all, am)

    # Per-node scores, reused by every grid step of the attention kernel.
    el = jnp.transpose(sc[:, :num_heads])    # (H, N)  src scores, N on lanes
    er = sc[:, num_heads:]                    # (N, H)  dst scores

    out_cols = f_out if is_final else hf
    out_dtype = jnp.float32 if is_final else compute_dtype
    kernel = functools.partial(
        gat_attn_kernel, num_heads=num_heads, f_out=f_out,
        negative_slope=negative_slope, is_final=is_final,
        compute_dtype=compute_dtype)

    out = pl.pallas_call(
        kernel,
        out_shape=jax.ShapeDtypeStruct((n_pad, out_cols), out_dtype),
        grid_spec=pltpu.PrefetchScalarGridSpec(
            num_scalar_prefetch=1,
            grid=(n_d, n_s),
            in_specs=[
                pl.BlockSpec((tile_d, tile_s), lambda d, s, bm: (d, s)),      # adj
                pl.BlockSpec((tile_s, hf), lambda d, s, bm: (s, 0)),          # z src
                pl.BlockSpec((num_heads, tile_s), lambda d, s, bm: (0, s)),   # el
                pl.BlockSpec((tile_d, num_heads), lambda d, s, bm: (d, 0)),   # er
            ],
            out_specs=pl.BlockSpec((tile_d, out_cols), lambda d, s, bm: (d, 0)),
            scratch_shapes=[
                pltpu.VMEM((num_heads, tile_d, 1), jnp.float32),      # running max
                pltpu.VMEM((num_heads, tile_d, 1), jnp.float32),      # running denom
                pltpu.VMEM((num_heads, tile_d, f_out), jnp.float32),  # accumulator
            ]),
        compiler_params=pltpu.CompilerParams(
            dimension_semantics=("parallel", "arbitrary"),
            vmem_limit_bytes=48 * 1024 * 1024),
    )(bmap, adj_i8, z, el, er)
    return out


def gat_forward(params, inputs, adj, *, negative_slope=0.2,
                compute_dtype=jnp.float32):
    """Forward pass of the GAT module (sparse_input=False, residual=False,
    dropout in eval mode)."""
    n = inputs.shape[0]
    n_pad, tile_d, tile_s = _choose_tiles(n)
    pad = n_pad - n
    h = jnp.pad(inputs.astype(jnp.float32), ((0, pad), (0, 0)))

    adj_f = jnp.pad(adj.astype(jnp.float32), ((0, pad), (0, pad)))
    # int8 0/1 mask: adjacency is only compared, never fed to the MXU.
    adj_i8 = (adj_f > 0).astype(jnp.int8)
    # per-(dst_tile, src_tile) nonzero map, scalar-prefetched to SMEM so the
    # attention kernel skips the dense exp/select work on empty blocks.
    n_d, n_s = n_pad // tile_d, n_pad // tile_s
    blk = adj_f.reshape(n_d, tile_d, n_s, tile_s)
    bmap = (jnp.max(blk, axis=(1, 3)) > 0).astype(jnp.int32).reshape(-1)

    for layer in params["hidden"]:
        h = gat_conv_layer(h, layer, adj_i8, bmap, tile_d=tile_d, tile_s=tile_s,
                           negative_slope=negative_slope, is_final=False,
                           compute_dtype=compute_dtype)
    out = gat_conv_layer(h, params["out"], adj_i8, bmap, tile_d=tile_d,
                         tile_s=tile_s, negative_slope=negative_slope,
                         is_final=True, compute_dtype=compute_dtype)
    return out[:n]


# ---------------------------------------------------------------------------
# Pure-JAX reference (for correctness check)
# ---------------------------------------------------------------------------
def gatconv_ref(h, W, al, ar, adj, neg_slope, act):
    z = jnp.einsum('nf,hfo->hno', h, W)                               # (H, N, Fo)
    el = jnp.sum(z * al, axis=-1)                                     # (H, N) src
    er = jnp.sum(z * ar, axis=-1)                                     # (H, N) dst
    e = er[:, :, None] + el[:, None, :]
    e = jnp.where(e > 0.0, e, neg_slope * e)
    e = jnp.where(adj[None] > 0.0, e, -1e9)
    m = jnp.max(e, axis=-1, keepdims=True)
    p = jnp.exp(e - m) * adj[None]
    alpha = p / jnp.sum(p, axis=-1, keepdims=True)
    out = jnp.einsum('hns,hsf->hnf', alpha, z)
    if act:
        out = jnp.where(out > 0.0, out, jnp.exp(jnp.minimum(out, 0.0)) - 1.0)
    return out


def gat_forward_ref(params, inputs, adj, *, negative_slope=0.2):
    h = inputs
    for layer in params["hidden"]:
        out = gatconv_ref(h, layer["W"], layer["attn_l"], layer["attn_r"],
                          adj, negative_slope, True)
        H, N, D = out.shape
        h = jnp.transpose(out, (1, 0, 2)).reshape(N, H * D)
    last = params["out"]
    out = gatconv_ref(h, last["W"], last["attn_l"], last["attn_r"],
                      adj, negative_slope, False)
    logits = jnp.mean(out, axis=0)
    return jax.nn.log_softmax(logits, axis=1)


# ---------------------------------------------------------------------------
# Parameter init (deterministic, xavier-like)
# ---------------------------------------------------------------------------
def init_gatconv(key, f_in, f_out, num_heads):
    k1, k2, k3 = jax.random.split(key, 3)
    sw = math.sqrt(2.0 / (f_in + f_out))
    sa = math.sqrt(2.0 / (f_out + 1))
    return dict(
        W=sw * jax.random.normal(k1, (num_heads, f_in, f_out), jnp.float32),
        attn_l=sa * jax.random.normal(k2, (num_heads, 1, f_out), jnp.float32),
        attn_r=sa * jax.random.normal(k3, (num_heads, 1, f_out), jnp.float32),
    )


# ---------------------------------------------------------------------------
if __name__ == "__main__":
    key = jax.random.PRNGKey(0)

    # small config consistent with the module's __init__
    N = 16                 # number of graph nodes
    in_dim = 8
    num_hidden = 16
    num_classes = 5
    num_layers = 2
    heads = [2, 2, 1]      # len == num_layers + 1

    # deterministic graph: ring + self loops (adj[dst, src])
    idx = jnp.arange(N)
    adj = jnp.zeros((N, N), jnp.float32)
    adj = adj.at[idx, idx].set(1.0)
    adj = adj.at[idx, (idx + 1) % N].set(1.0)
    adj = adj.at[idx, (idx - 1) % N].set(1.0)

    # parameters
    k_in, *layer_keys = jax.random.split(key, num_layers + 2)
    hidden = []
    f_in = in_dim
    for l in range(num_layers):
        hidden.append(init_gatconv(layer_keys[l], f_in, num_hidden, heads[l]))
        f_in = num_hidden * heads[l]
    out_layer = init_gatconv(layer_keys[num_layers], f_in, num_classes, heads[-1])
    params = dict(hidden=hidden, out=out_layer)

    # inputs ("empty" second arg of the reference forward is unused)
    inputs = jax.random.normal(k_in, (N, in_dim), jnp.float32)

    # TODO(synk): feat_drop / attn_drop are eval-mode identities (p=0);
    # sparse_input and residual are False as in the reference configuration.
    logits = jax.block_until_ready(gat_forward(params, inputs, adj))
    ref = gat_forward_ref(params, inputs, adj)
    assert logits.shape == (N, num_classes)
    # exact division at finalize -> tight tolerance vs the f32 reference
    assert bool(jnp.allclose(logits, ref, atol=5e-3, rtol=5e-3)), \
        float(jnp.max(jnp.abs(logits - ref)))

    # bf16-MXU-input path (recommended on v6e/v7x); vector math stays f32.
    logits_bf16 = jax.block_until_ready(
        gat_forward(params, inputs, adj, compute_dtype=jnp.bfloat16))
    assert bool(jnp.allclose(logits_bf16, ref, atol=1e-1, rtol=1e-1)), \
        float(jnp.max(jnp.abs(logits_bf16 - ref)))

    print("KERNEL_OK")
</pallas_src>

<mosaic_0001>
module attributes {stable_mosaic.version = 11 : i64} {
  func.func @proj_kernel(%arg0: i32, %arg1: memref<16x8xf32, #tpu.memory_space<vmem>>, %arg2: memref<8x32xf32, #tpu.memory_space<vmem>>, %arg3: memref<32x4xf32, #tpu.memory_space<vmem>>, %arg4: memref<16x32xf32, #tpu.memory_space<vmem>>, %arg5: memref<16x4xf32, #tpu.memory_space<vmem>>) attributes {dimension_semantics = [#tpu.dimension_semantics<parallel>], iteration_bounds = array<i64: 1>, scalar_prefetch = 0 : i64, scratch_operands = 0 : i64, tpu.core_type = #tpu.core_type<tc>, window_params = [{transform_indices = @transform_0, window_bounds = array<i64: 16, 8>}, {pipeline_mode = #tpu.pipeline_mode<synchronous>, transform_indices = @transform_1, window_bounds = array<i64: 8, 32>}, {pipeline_mode = #tpu.pipeline_mode<synchronous>, transform_indices = @transform_2, window_bounds = array<i64: 32, 4>}, {transform_indices = @transform_3, window_bounds = array<i64: 16, 32>}, {transform_indices = @transform_4, window_bounds = array<i64: 16, 4>}]} {
    %c0 = arith.constant 0 : index
    %c0_0 = arith.constant 0 : index
    %0 = vector.load %arg1[%c0, %c0_0] : memref<16x8xf32, #tpu.memory_space<vmem>>, vector<16x8xf32>
    %c0_1 = arith.constant 0 : index
    %c0_2 = arith.constant 0 : index
    %1 = vector.load %arg2[%c0_1, %c0_2] : memref<8x32xf32, #tpu.memory_space<vmem>>, vector<8x32xf32>
    %cst = arith.constant dense<0.000000e+00> : vector<16x32xf32>
    %2 = tpu.matmul %0, %1, %cst {dimension_numbers = #tpu.dot_dimension_numbers<[1], [0], [0], [1], [0, 0, 1, 1], [], []>} : vector<16x8xf32>, vector<8x32xf32>, vector<16x32xf32> -> vector<16x32xf32>
    %c0_3 = arith.constant 0 : index
    %c0_4 = arith.constant 0 : index
    %3 = vector.load %arg4[%c0_3, %c0_4] : memref<16x32xf32, #tpu.memory_space<vmem>>, vector<16x32xf32>
    tpu.vector_store %arg4[%c0_3, %c0_4], %2 {strides = array<i32>} : memref<16x32xf32, #tpu.memory_space<vmem>>, vector<16x32xf32>,
    %c0_5 = arith.constant 0 : index
    %c0_6 = arith.constant 0 : index
    %4 = vector.load %arg3[%c0_5, %c0_6] : memref<32x4xf32, #tpu.memory_space<vmem>>, vector<32x4xf32>
    %cst_7 = arith.constant dense<0.000000e+00> : vector<16x4xf32>
    %5 = tpu.matmul %2, %4, %cst_7 {dimension_numbers = #tpu.dot_dimension_numbers<[1], [0], [0], [1], [0, 0, 1, 1], [], []>} : vector<16x32xf32>, vector<32x4xf32>, vector<16x4xf32> -> vector<16x4xf32>
    %c0_8 = arith.constant 0 : index
    %c0_9 = arith.constant 0 : index
    %6 = vector.load %arg5[%c0_8, %c0_9] : memref<16x4xf32, #tpu.memory_space<vmem>>, vector<16x4xf32>
    tpu.vector_store %arg5[%c0_8, %c0_9], %5 {strides = array<i32>} : memref<16x4xf32, #tpu.memory_space<vmem>>, vector<16x4xf32>,
    return
  }
  func.func @transform_0(%arg0: i32) -> (i32, i32) {
    %c0_i32 = arith.constant 0 : i32
    %c0_i32_0 = arith.constant 0 : i32
    return %arg0, %c0_i32 : i32, i32
  }
  func.func @transform_1(%arg0: i32) -> (i32, i32) {
    %c0_i32 = arith.constant 0 : i32
    %c0_i32_0 = arith.constant 0 : i32
    %c0_i32_1 = arith.constant 0 : i32
    return %c0_i32, %c0_i32_0 : i32, i32
  }
  func.func @transform_2(%arg0: i32) -> (i32, i32) {
    %c0_i32 = arith.constant 0 : i32
    %c0_i32_0 = arith.constant 0 : i32
    %c0_i32_1 = arith.constant 0 : i32
    return %c0_i32, %c0_i32_0 : i32, i32
  }
  func.func @transform_3(%arg0: i32) -> (i32, i32) {
    %c0_i32 = arith.constant 0 : i32
    %c0_i32_0 = arith.constant 0 : i32
    return %arg0, %c0_i32 : i32, i32
  }
  func.func @transform_4(%arg0: i32) -> (i32, i32) {
    %c0_i32 = arith.constant 0 : i32
    %c0_i32_0 = arith.constant 0 : i32
    return %arg0, %c0_i32 : i32, i32
  }
}

</mosaic_0001>

<bundles_post_ra>
// kernel: tpu_custom_call.1
= control target key start
LH: loop header
LB: loop body
LE: loop exit
PB: predicated region body
PF: predicated region fallthrough
CT: control target
= control target key end

     0   :  { %vm20_vm0 = vcmask 64512   ;;  %s344_s0 = inlined_call_operand.vmem [shape: f32[16,8], index: 0, kind: input, shape index: {}]   ;;  %s345_s1 = inlined_call_operand.vmem [shape: f32[8,32], index: 1, kind: input, shape index: {}]   ;;  %s346_s2 = inlined_call_operand.vmem [shape: f32[32,4], index: 2, kind: input, shape index: {}]   ;;  %s347_s3 = inlined_call_operand.hbm [shape: f32[16,32], index: 3, kind: output, shape index: {0}]   ;;  %s348_s4 = inlined_call_operand.vmem [shape: f32[16,4], index: 4, kind: output, shape index: {1}]  }
   0x1   :  { %v19_v0 = vld [vmem:[%s345_s1] sm:$0xff]  ;;  %v18_v2 = vld [vmem:[%s344_s0 + $0x8] sm:$0xff]  ;;  %v107_v5 = vld [vmem:[%s346_s2 + $0x10] sm:$0xff] }
   0x2   :  { %v17_v1 = vld [vmem:[%s344_s0] sm:$0xff]  ;;  %226 = vmatprep.subr.mxu0 %v19_v0  ;;  %v106_v4 = vld [vmem:[%s346_s2 + $0x8] sm:$0xff]  ;;  %v108_v7 = vld [vmem:[%s346_s2 + $0x18] sm:$0xff] }
   0x3   :  { %228 = vmatprep.mubr.msk.f32.mxu0 %vm20_vm0, %v17_v1  ;;  %v105_v3 = vld [vmem:[%s346_s2] sm:$0xff]  ;;  %227 = vmatpush3.msra.mxu0 %v19_v0 }
   0x4   :  { %v242_v6 = vpack.c.bf16 %v106_v4, %v105_v3 }
   0x5   :  { %10 = vsyncpa [#allocation3], 0  ;;  %229 = vmatmul.mubr.msk.f32.vlgmr.msra.gmra.mrb[0].mxu0 %vm20_vm0, %v18_v2  ;;  %v246_v8 = vpack.c.bf16 %v108_v7, %v107_v5  ;;  %vm102_vm1 = vcmask 261120   ;;  %s277_s0 = smov [#allocation2]  }
   0x6   :  { %243 = vmatprep.subr.bf16.mxu1 %v242_v6  ;;  %s198_s28 = sshll.u32 %s277_s0, 4  ;;  %s199_s28 = int_to_ptr.vmem [resolvable:$true] %s198_s28 }
   0x7   :  { %245 = vmatpush3.bf16.msra.mxu1 %v242_v6  ;;  %s253_s29 = scalar_lea.vmem %s199_s28, 256  ;;  %p258_p1 = scmp.lt.s32.totalorder %s199_s28, %s199_s28 }
   0x8   :  { %247 = vmatprep.subr.bf16.mxu1 %v246_v8  ;;  %p254_p0 = scmp.ne.s32.totalorder %s199_s28, %s253_s29  ;;  %p259_p2 = scmp.lt.s32.totalorder %s253_s29, %s253_s29 }
   0xa   :  { %p260_p3 = por %p259_p2, %p258_p1 }
   0xb   :  { %249 = vmatpush3.bf16.msra.mxu1 %v246_v8 }
   0xc   :  { %p261_p4 = pnand %p260_p3, %p254_p0 }
  0xd8   :  { %v230_v9 = vpop.f32.mrb[0].mxu0 }
  0xd9   :  { %104 = vst.msk [vmem:[#allocation2 + $0x8] sm:$0xff] %vm102_vm1, %v230_v9  ;;  %v93_v10 = vpop.f32.mrb[1].mxu0 }
  0xda   :  { %103 = vst.msk [vmem:[#allocation2] sm:$0xff] %vm102_vm1, %v93_v10  ;;  %239 = vmatprep.mubr.msk.f32.mxu1 %vm102_vm1, %v93_v10 }
  0xdb   :  { %240 = vmatmul.mubr.msk.f32.vlgmr.msra.gmra.mrb[0].mxu1 %vm102_vm1, %v230_v9 }
  0xdc   :  { %264 = shalt.err (!%p261_p4)
}
  0xdd   :  { %s265_s5 = scalar_lea.hbm %s347_s3, 256 }
  0xde   :  { %p266_p5 = scmp.ne.s32.totalorder %s347_s3, %s265_s5  ;;  %p269_p6 = scmp.lt.u32.totalorder %s265_s5, %s347_s3 }
  0xe0   :  { %p271_p7 = pnand %p269_p6, %p266_p5 }
  0xe2   :  { %274 = shalt.err (!%p271_p7)
}
  0xe3   :  { %s278_s10 = smov 128   ;;  %s279_s11 = smov 8   ;;  %vm190_vm2 = vcmask 31744  }
  0xe4   :  { %204 = dma.vmem_to_hbm [thread:$0]  %s199_s28, 256, %s347_s3, [#allocation3], %s278_s10, %s278_s10, %s279_s11  }
 0x1ae   :  { %v241_v11 = vpop.f32.mrb[0].mxu1 }
 0x1af   :  { %192 = vst.msk [vmem:[%s348_s4 + $0x8] sm:$0xff] %vm190_vm2, %v241_v11  ;;  %v181_v12 = vpop.f32.mrb[1].mxu1 }
 0x1b0   :  { %191 = vst.msk [vmem:[%s348_s4] sm:$0xff] %vm190_vm2, %v181_v12 }
 0x1b1   :  { %275 = dma.done.wait [#allocation3], 256  }
 0x1b2   :  { %276 = vsyncadd [#allocation3], 4294967040 }
 0x1b3   :  { %212 = vsyncpa [#allocation3], 1 }

</bundles_post_ra>
